<compile_context>
chip_gen: v7x
topology: tpu7x:2x2x1
jax: 0.10.0
libtpu: 0.0.40
codegen_flags: <defaults>
</compile_context>

<pallas_src>
import math

import jax
import jax.numpy as jnp
from jax.experimental import pallas as pl
from jax.experimental.pallas import tpu as pltpu


# ---------------------------------------------------------------------------
# Kernels
# ---------------------------------------------------------------------------
def _mm_f32_kernel(x_ref, w_ref, o_ref):
    """f32 output: accumulate directly into the resident output block."""
    @pl.when(pl.program_id(2) == 0)
    def _():
        o_ref[...] = jnp.zeros_like(o_ref)

    o_ref[...] += jnp.dot(x_ref[...], w_ref[...],
                          preferred_element_type=jnp.float32)


def _mm_bias_f32_kernel(x_ref, w_ref, b_ref, o_ref):
    """f32 output + bias folded into the k==0 init (no finalize add)."""
    @pl.when(pl.program_id(2) == 0)
    def _():
        o_ref[...] = jnp.broadcast_to(b_ref[...], o_ref.shape)

    o_ref[...] += jnp.dot(x_ref[...], w_ref[...],
                          preferred_element_type=jnp.float32)


def _mm_acc_kernel(x_ref, w_ref, o_ref, acc_ref):
    """Non-f32 output: f32 VMEM accumulator + cast at K finalize."""
    k = pl.program_id(2)

    @pl.when(k == 0)
    def _():
        acc_ref[...] = jnp.zeros_like(acc_ref)

    acc_ref[...] += jnp.dot(x_ref[...], w_ref[...],
                            preferred_element_type=jnp.float32)

    @pl.when(k == pl.num_programs(2) - 1)
    def _():
        o_ref[...] = acc_ref[...].astype(o_ref.dtype)


def _mm_bias_acc_kernel(x_ref, w_ref, b_ref, o_ref, acc_ref):
    k = pl.program_id(2)

    @pl.when(k == 0)
    def _():
        acc_ref[...] = jnp.broadcast_to(b_ref[...], acc_ref.shape)

    acc_ref[...] += jnp.dot(x_ref[...], w_ref[...],
                            preferred_element_type=jnp.float32)

    @pl.when(k == pl.num_programs(2) - 1)
    def _():
        o_ref[...] = acc_ref[...].astype(o_ref.dtype)


# ---------------------------------------------------------------------------
# Tile / VMEM heuristics
# ---------------------------------------------------------------------------
def _round_up(x, m):
    return ((x + m - 1) // m) * m


def _vmem_budget_bytes():
    """Per-generation budget for the double-buffered tile working set."""
    try:
        phys = int(pltpu.get_tpu_info().vmem_capacity_bytes)
    except Exception:
        phys = 64 << 20  # conservative (v7x-sized) fallback
    # ~quarter of physical VMEM; never above 28 MiB (safe for v7x's 64 MiB part),
    # never below 12 MiB.
    return max(12 << 20, min(phys // 4, 28 << 20))


def _balanced_tile(dim, cap, align):
    """Full dim if it fits under cap (always a legal block extent); otherwise a
    balanced aligned tile that minimizes padded-edge waste."""
    if dim <= cap:
        return dim
    nblocks = pl.cdiv(dim, cap)
    return min(cap, _round_up(pl.cdiv(dim, nblocks), align))


def _pick_tk(K, cap):
    """Reduction tile: prefer a 128-multiple divisor of K so no per-call K pad
    (wrapper-side pads are un-pipelined HBM copies)."""
    if K <= cap:
        return K
    t = (cap // 128) * 128
    while t >= 128:
        if K % t == 0:
            return t
        t -= 128
    return _balanced_tile(K, cap, 128)


# ---------------------------------------------------------------------------
# Pallas GEMM wrapper
# ---------------------------------------------------------------------------
def _linear_pallas_2d(x2d, w_io, bias_f32):
    """x2d: (M, K), w_io: (K, N), bias_f32: (1, N) f32 or None -> (M, N)."""
    M, K = x2d.shape
    _, N = w_io.shape
    out_dtype = x2d.dtype
    in_bytes = x2d.dtype.itemsize
    out_bytes = jnp.dtype(out_dtype).itemsize
    f32_out = out_dtype == jnp.float32

    budget = _vmem_budget_bytes()
    tm_cap, tn_cap, tk_cap = 512, 512, 1024
    if budget >= (24 << 20):
        tn_cap = 1024  # large-VMEM parts (v5e/v6e): halve activation re-reads

    tm = _balanced_tile(M, tm_cap, 8)
    tn = _balanced_tile(N, tn_cap, 128)
    tk = _pick_tk(K, tk_cap)

    # Megacore: if the whole problem would be one (1,1,Kt) grid, split N so at
    # least two "parallel" programs exist (v7x has 2 TensorCores per chip).
    if M <= tm and N <= tn and N >= 256:
        tn = _round_up(pl.cdiv(N, 2), 128)

    def working_set(tm_, tn_, tk_):
        ws = 2 * (tm_ * tk_ + tk_ * tn_) * in_bytes   # double-buffered inputs
        ws += 2 * tm_ * tn_ * out_bytes               # double-buffered output
        if not f32_out:
            ws += tm_ * tn_ * 4                       # f32 acc scratch
        return ws

    # Shrink until the double-buffered working set fits the per-chip budget.
    while working_set(tm, tn, tk) > budget:
        if tk >= 256:
            tk = max(128, tk // 2)
        elif tn >= 256:
            tn = max(128, tn // 2)
        elif tm >= 16:
            tm = max(8, tm // 2)
        else:
            break

    # Zero-pad only K (reduction correctness); M/N ragged edges are handled by
    # Pallas dropping out-of-bounds output writes.
    Kp = _round_up(K, tk)
    if Kp != K:
        x2d = jnp.pad(x2d, ((0, 0), (0, Kp - K)))
        w_io = jnp.pad(w_io, ((0, Kp - K), (0, 0)))

    grid = (pl.cdiv(M, tm), pl.cdiv(N, tn), Kp // tk)

    in_specs = [
        pl.BlockSpec((tm, tk), lambda i, j, k: (i, k)),
        pl.BlockSpec((tk, tn), lambda i, j, k: (k, j)),
    ]
    operands = [x2d, w_io]

    has_bias = bias_f32 is not None
    if has_bias:
        in_specs.append(pl.BlockSpec((1, tn), lambda i, j, k: (0, j)))
        operands.append(bias_f32)
        kernel = _mm_bias_f32_kernel if f32_out else _mm_bias_acc_kernel
    else:
        kernel = _mm_f32_kernel if f32_out else _mm_acc_kernel

    scratch = [] if f32_out else [pltpu.VMEM((tm, tn), jnp.float32)]

    ws = working_set(tm, tn, tk)
    vmem_limit = int(min(32 << 20, max(16 << 20, ws * 3 // 2 + (2 << 20))))

    cost = pl.CostEstimate(
        flops=2 * M * N * K,
        transcendentals=0,
        bytes_accessed=(M * K + K * N) * in_bytes + M * N * out_bytes,
    )

    return pl.pallas_call(
        kernel,
        out_shape=jax.ShapeDtypeStruct((M, N), out_dtype),
        grid_spec=pltpu.PrefetchScalarGridSpec(
            num_scalar_prefetch=0,
            grid=grid,
            in_specs=in_specs,
            out_specs=pl.BlockSpec((tm, tn), lambda i, j, k: (i, j)),
            scratch_shapes=scratch,
        ),
        compiler_params=pltpu.CompilerParams(
            dimension_semantics=("parallel", "parallel", "arbitrary"),
            vmem_limit_bytes=vmem_limit,
        ),
        cost_estimate=cost,
    )(*operands)


def linear_norm(x, weight_io, bias=None, *, force_pallas=False,
                compute_dtype=None):
    """y = x @ weight_io + bias   (same semantics as torch.nn.Linear).

    x:          (..., in_dim)
    weight_io:  (in_dim, out_dim) -- pre-transposed PyTorch weight (weight.T),
                kept in this layout from init so no per-call HBM transpose.
    bias:       (out_dim,) or None
    compute_dtype: optional (e.g. jnp.bfloat16) to run the MXU at bf16-native
                throughput; accumulation stays f32 and the output keeps x.dtype.
    """
    in_dim, out_dim = weight_io.shape
    lead_shape = x.shape[:-1]
    M = int(math.prod(lead_shape)) if lead_shape else 1

    if M == 0:
        return jnp.zeros((*lead_shape, out_dim), dtype=x.dtype)

    out_dtype = x.dtype
    x2d = x.reshape(M, in_dim)
    w_io = weight_io
    if compute_dtype is not None:
        x2d = x2d.astype(compute_dtype)
        w_io = w_io.astype(compute_dtype)
    elif w_io.dtype != x2d.dtype:
        w_io = w_io.astype(x2d.dtype)

    # Bias stays f32 until it hits the f32 accumulator (no early downcast).
    bias_f32 = None if bias is None else bias.astype(jnp.float32).reshape(1, out_dim)

    # Tiny problems: XLA's fused gemm beats pallas_call launch + DMA setup.
    tiny = (M * in_dim * out_dim) < (1 << 21)
    if tiny and not force_pallas:
        out2d = jnp.dot(x2d, w_io, preferred_element_type=jnp.float32)
        if bias_f32 is not None:
            out2d = out2d + bias_f32
        out2d = out2d.astype(out_dtype)
    else:
        out2d = _linear_pallas_2d(x2d, w_io, bias_f32)
        if out2d.dtype != out_dtype:
            out2d = out2d.astype(out_dtype)

    return out2d.reshape(*lead_shape, out_dim)


# ---------------------------------------------------------------------------
# Parameter init (matches torch.nn.init.xavier_uniform_ + nn.Linear bias init)
# ---------------------------------------------------------------------------
def init_linear_norm_params(key, in_dim, out_dim, bias=True, w_init_gain="linear"):
    """Returns weight in (in_dim, out_dim) layout (already transposed) and bias."""
    gain = 1.0  # calculate_gain('linear') == 1.0
    limit = gain * math.sqrt(6.0 / (in_dim + out_dim))
    wkey, bkey = jax.random.split(key)
    weight_io = jax.random.uniform(
        wkey, (in_dim, out_dim), dtype=jnp.float32, minval=-limit, maxval=limit
    )
    if bias:
        b_lim = 1.0 / math.sqrt(in_dim)
        b = jax.random.uniform(
            bkey, (out_dim,), dtype=jnp.float32, minval=-b_lim, maxval=b_lim
        )
    else:
        b = None
    return weight_io, b


# ---------------------------------------------------------------------------
# Demo / correctness check
# ---------------------------------------------------------------------------
if __name__ == "__main__":
    key = jax.random.PRNGKey(0)
    kx, kp, kx2, kp2 = jax.random.split(key, 4)

    # 1) Small module-like shape, forced through the Pallas kernel.
    batch, seq, in_dim, out_dim = 2, 8, 32, 64
    x = jax.random.normal(kx, (batch, seq, in_dim), dtype=jnp.float32)
    weight_io, bias = init_linear_norm_params(kp, in_dim, out_dim, bias=True)

    y = linear_norm(x, weight_io, bias, force_pallas=True)
    jax.block_until_ready(y)
    y_ref = x @ weight_io + bias
    assert y.shape == (batch, seq, out_dim)
    assert jnp.allclose(y, y_ref, atol=1e-5, rtol=1e-5)

    # 2) Larger shape that exercises the multi-block tiled grid (auto-dispatch),
    #    with a ragged M (not a multiple of the tile) to exercise unpadded edges.
    B2, S2, K2, N2 = 4, 300, 256, 512
    x2 = jax.random.normal(kx2, (B2, S2, K2), dtype=jnp.float32)
    w2, b2 = init_linear_norm_params(kp2, K2, N2, bias=True)

    y2 = linear_norm(x2, w2, b2)
    jax.block_until_ready(y2)
    y2_ref = x2 @ w2 + b2
    assert y2.shape == (B2, S2, N2)
    assert jnp.allclose(y2, y2_ref, atol=1e-4, rtol=1e-4)

    # 3) Bias-free variant (forced Pallas).
    y3 = linear_norm(x2, w2, None, force_pallas=True)
    jax.block_until_ready(y3)
    assert jnp.allclose(y3, x2 @ w2, atol=1e-4, rtol=1e-4)

    print("KERNEL_OK")
</pallas_src>

<mosaic_0001>
module attributes {stable_mosaic.version = 11 : i64} {
  func.func @_mm_bias_f32_kernel(%arg0: i32, %arg1: i32, %arg2: i32, %arg3: memref<16x32xf32, #tpu.memory_space<vmem>>, %arg4: memref<32x64xf32, #tpu.memory_space<vmem>>, %arg5: memref<1x64xf32, #tpu.memory_space<vmem>>, %arg6: memref<16x64xf32, #tpu.memory_space<vmem>>) attributes {dimension_semantics = [#tpu.dimension_semantics<parallel>, #tpu.dimension_semantics<parallel>, #tpu.dimension_semantics<arbitrary>], iteration_bounds = array<i64: 1, 1, 1>, scalar_prefetch = 0 : i64, scratch_operands = 0 : i64, tpu.core_type = #tpu.core_type<tc>, window_params = [{transform_indices = @transform_0, window_bounds = array<i64: 16, 32>}, {transform_indices = @transform_1, window_bounds = array<i64: 32, 64>}, {transform_indices = @transform_2, window_bounds = array<i64: 1, 64>}, {transform_indices = @transform_3, window_bounds = array<i64: 16, 64>}]} {
    %c0_i32 = arith.constant 0 : i32
    %0 = arith.cmpi eq, %arg2, %c0_i32 : i32
    %1 = arith.extui %0 : i1 to i32
    %c0_i32_0 = arith.constant 0 : i32
    %2 = arith.cmpi ne, %1, %c0_i32_0 : i32
    scf.if %2 {
      %c0_8 = arith.constant 0 : index
      %c0_9 = arith.constant 0 : index
      %9 = vector.load %arg5[%c0_8, %c0_9] : memref<1x64xf32, #tpu.memory_space<vmem>>, vector<1x64xf32>
      %10 = vector.shape_cast %9 : vector<1x64xf32> to vector<1x64xf32>
      %11 = vector.broadcast %10 : vector<1x64xf32> to vector<16x64xf32>
      %c0_10 = arith.constant 0 : index
      %c0_11 = arith.constant 0 : index
      %12 = vector.load %arg6[%c0_10, %c0_11] : memref<16x64xf32, #tpu.memory_space<vmem>>, vector<16x64xf32>
      tpu.vector_store %arg6[%c0_10, %c0_11], %11 {strides = array<i32>} : memref<16x64xf32, #tpu.memory_space<vmem>>, vector<16x64xf32>,
    } else {
    }
    %c0 = arith.constant 0 : index
    %c0_1 = arith.constant 0 : index
    %3 = vector.load %arg6[%c0, %c0_1] : memref<16x64xf32, #tpu.memory_space<vmem>>, vector<16x64xf32>
    %c0_2 = arith.constant 0 : index
    %c0_3 = arith.constant 0 : index
    %4 = vector.load %arg3[%c0_2, %c0_3] : memref<16x32xf32, #tpu.memory_space<vmem>>, vector<16x32xf32>
    %c0_4 = arith.constant 0 : index
    %c0_5 = arith.constant 0 : index
    %5 = vector.load %arg4[%c0_4, %c0_5] : memref<32x64xf32, #tpu.memory_space<vmem>>, vector<32x64xf32>
    %cst = arith.constant dense<0.000000e+00> : vector<16x64xf32>
    %6 = tpu.matmul %4, %5, %cst {dimension_numbers = #tpu.dot_dimension_numbers<[1], [0], [0], [1], [0, 0, 1, 1], [], []>} : vector<16x32xf32>, vector<32x64xf32>, vector<16x64xf32> -> vector<16x64xf32>
    %7 = arith.addf %3, %6 : vector<16x64xf32>
    %c0_6 = arith.constant 0 : index
    %c0_7 = arith.constant 0 : index
    %8 = vector.load %arg6[%c0_6, %c0_7] : memref<16x64xf32, #tpu.memory_space<vmem>>, vector<16x64xf32>
    tpu.vector_store %arg6[%c0_6, %c0_7], %7 {strides = array<i32>} : memref<16x64xf32, #tpu.memory_space<vmem>>, vector<16x64xf32>,
    return
  }
  func.func @transform_0(%arg0: i32, %arg1: i32, %arg2: i32) -> (i32, i32) {
    %c0_i32 = arith.constant 0 : i32
    return %arg0, %arg2 : i32, i32
  }
  func.func @transform_1(%arg0: i32, %arg1: i32, %arg2: i32) -> (i32, i32) {
    %c0_i32 = arith.constant 0 : i32
    return %arg2, %arg1 : i32, i32
  }
  func.func @transform_2(%arg0: i32, %arg1: i32, %arg2: i32) -> (i32, i32) {
    %c0_i32 = arith.constant 0 : i32
    %c0_i32_0 = arith.constant 0 : i32
    return %c0_i32, %arg1 : i32, i32
  }
  func.func @transform_3(%arg0: i32, %arg1: i32, %arg2: i32) -> (i32, i32) {
    %c0_i32 = arith.constant 0 : i32
    return %arg0, %arg1 : i32, i32
  }
}

</mosaic_0001>

<bundles_post_ra>
// kernel: tpu_custom_call.1
= control target key start
LH: loop header
LB: loop body
LE: loop exit
PB: predicated region body
PF: predicated region fallthrough
CT: control target
= control target key end

     0   :  { %8 = vsyncpa [#allocation3], 0  ;;  %s354_s0 = inlined_call_operand.hbm [shape: f32[16,32], index: 0, kind: input, shape index: {}]   ;;  %s355_s1 = inlined_call_operand.hbm [shape: f32[32,64], index: 1, kind: input, shape index: {}]   ;;  %s356_s2 = inlined_call_operand.vmem [shape: f32[1,64], index: 2, kind: input, shape index: {}]   ;;  %s357_s3 = inlined_call_operand.hbm [shape: f32[16,64], index: 3, kind: output, shape index: {}]  }
   0x1   :  { %9 = vsyncpa [#allocation6], 0 }
   0x2   :  { %10 = vsyncpa [#allocation4], 0  ;;  %s275_s12 = smov [#allocation2]   ;;  %s203_s16 = scalar_lea.hbm %s354_s0, 256 }
   0x3   :  { %s16_s13 = sshll.u32 %s275_s12, 4  ;;  %p204_p0 = scmp.ne.s32.totalorder %s354_s0, %s203_s16  ;;  %s17_s13 = int_to_ptr.vmem [resolvable:$true] %s16_s13 }
   0x4   :  { %p207_p1 = scmp.lt.u32.totalorder %s203_s16, %s354_s0 }
   0x6   :  { %p209_p2 = pnand %p207_p1, %p204_p0 }
   0x8   :  { %212 = shalt.err (!%p209_p2)
}
   0x9   :  { %s213_s21 = scalar_lea.vmem %s17_s13, 256  ;;  %p218_p4 = scmp.lt.s32.totalorder %s17_s13, %s17_s13 }
   0xa   :  { %p214_p3 = scmp.ne.s32.totalorder %s17_s13, %s213_s21  ;;  %p219_p5 = scmp.lt.s32.totalorder %s213_s21, %s213_s21 }
   0xc   :  { %p220_p6 = por %p219_p5, %p218_p4 }
   0xe   :  { %p221_p7 = pnand %p220_p6, %p214_p3 }
  0x10   :  { %224 = shalt.err (!%p221_p7)
}
  0x11   :  { %s276_s22 = smov 128   ;;  %s277_s23 = smov 8  }
  0x12   :  { %22 = dma.hbm_to_vmem [thread:$0]  %s354_s0, 256, %s17_s13, [#allocation3], %s276_s22, %s276_s22, %s277_s23  }
  0x13   :  { %s278_s26 = smov [#allocation5]   ;;  %s225_s30 = scalar_lea.hbm %s355_s1, 512 }
  0x14   :  { %s28_s27 = sshll.u32 %s278_s26, 4  ;;  %p226_p8 = scmp.ne.s32.totalorder %s355_s1, %s225_s30  ;;  %s29_s27 = int_to_ptr.vmem [resolvable:$true] %s28_s27 }
  0x15   :  { %p229_p9 = scmp.lt.u32.totalorder %s225_s30, %s355_s1 }
  0x17   :  { %p231_p10 = pnand %p229_p9, %p226_p8 }
  0x19   :  { %234 = shalt.err (!%p231_p10)
}
  0x1a   :  { %s235_s8 = scalar_lea.vmem %s29_s27, 512  ;;  %p240_p12 = scmp.lt.s32.totalorder %s29_s27, %s29_s27 }
  0x1b   :  { %p236_p11 = scmp.ne.s32.totalorder %s29_s27, %s235_s8  ;;  %p241_p13 = scmp.lt.s32.totalorder %s235_s8, %s235_s8 }
  0x1d   :  { %p242_p0 = por %p241_p13, %p240_p12 }
  0x1f   :  { %p243_p1 = pnand %p242_p0, %p236_p11 }
  0x21   :  { %246 = shalt.err (!%p243_p1)
}
  0x22   :  { %34 = dma.hbm_to_vmem [thread:$0]  %s355_s1, 512, %s29_s27, [#allocation6], %s276_s22, %s276_s22, %s277_s23  }
  0x23   :  { %269 = dma.done.wait [#allocation3], 256  }
  0x24   :  { %270 = vsyncadd [#allocation3], 4294967040 }
  0x25   :  { %271 = dma.done.wait [#allocation6], 512  }
  0x26   :  { %272 = vsyncadd [#allocation6], 4294966784  ;;  %vm65_vm0 = vcmask 261120   ;;  %v61_v0 = vld [vmem:[#allocation5] sm:$0xff]  ;;  %v62_v1 = vld [vmem:[#allocation5 + $0x8] sm:$0xff]  ;;  %vm54_vm1 = vcmask 523264  }
  0x27   :  { %v63_v2 = vld [vmem:[#allocation5 + $0x10] sm:$0xff]  ;;  %v190_v3 = vpack.c.bf16 %v62_v1, %v61_v0  ;;  %v64_v4 = vld [vmem:[#allocation5 + $0x18] sm:$0xff]  ;;  %s279_s1 = smov [#allocation7]  }
  0x28   :  { %v59_v5 = vld [vmem:[#allocation2] sm:$0xff]  ;;  %v194_v6 = vpack.c.bf16 %v64_v4, %v63_v2  ;;  %v60_v8 = vld [vmem:[#allocation2 + $0x8] sm:$0xff]  ;;  %s157_s12 = sshll.u32 %s279_s1, 4  ;;  %s158_s12 = int_to_ptr.vmem [resolvable:$true] %s157_s12 }
  0x29   :  { %187 = vmatprep.mubr.msk.f32.mxu0 %vm65_vm0, %v59_v5  ;;  %v170_v7 = vld [vmem:[%s356_s2] ss:$0 sm:$0xff]  ;;  %191 = vmatprep.subr.bf16.mxu0 %v190_v3  ;;  %s247_s2 = scalar_lea.vmem %s158_s12, 256  ;;  %p252_p3 = scmp.lt.s32.totalorder %s158_s12, %s158_s12 }
  0x2a   :  { %56 = vst.msk [vmem:[#allocation7 + $0x8] sm:$0xff] %vm54_vm1, %v170_v7  ;;  %55 = vst.msk [vmem:[#allocation7] sm:$0xff] %vm54_vm1, %v170_v7  ;;  %193 = vmatpush3.bf16.msra.mxu0 %v190_v3  ;;  %p248_p2 = scmp.ne.s32.totalorder %s158_s12, %s247_s2  ;;  %p253_p4 = scmp.lt.s32.totalorder %s247_s2, %s247_s2 }
  0x2b   :  { %195 = vmatprep.subr.bf16.mxu0 %v194_v6 }
  0x2c   :  { %p254_p5 = por %p253_p4, %p252_p3 }
  0x2e   :  { %197 = vmatpush3.bf16.msra.mxu0 %v194_v6  ;;  %p255_p6 = pnand %p254_p5, %p248_p2 }
  0x31   :  { %188 = vmatmul.mubr.msk.f32.vlgmr.msra.gmra.mrb[0].mxu0 %vm65_vm0, %v60_v8  ;;  %v58_v9 = vld [vmem:[#allocation7 + $0x8] sm:$0xff]  ;;  %v57_v10 = vld [vmem:[#allocation7] sm:$0xff] }
 0x104   :  { %v189_v11 = vpop.f32.mrb[0].mxu0 }
 0x105   :  { %v148_v12 = vadd.f32 %v189_v11, %v58_v9  ;;  %v138_v13 = vpop.f32.mrb[1].mxu0 }
 0x106   :  { %v147_v14 = vadd.f32 %v138_v13, %v57_v10 }
 0x107   :  { %151 = vst.msk [vmem:[#allocation7 + $0x8] sm:$0xff] %vm54_vm1, %v148_v12 }
 0x108   :  { %150 = vst.msk [vmem:[#allocation7] sm:$0xff] %vm54_vm1, %v147_v14 }
 0x109   :  { %258 = shalt.err (!%p255_p6)
}
 0x10a   :  { %s259_s15 = scalar_lea.hbm %s357_s3, 256 }
 0x10b   :  { %p260_p7 = scmp.ne.s32.totalorder %s357_s3, %s259_s15  ;;  %p263_p8 = scmp.lt.u32.totalorder %s259_s15, %s357_s3 }
 0x10d   :  { %p265_p9 = pnand %p263_p8, %p260_p7 }
 0x10f   :  { %268 = shalt.err (!%p265_p9)
}
 0x110   :  { %163 = dma.vmem_to_hbm [thread:$0]  %s158_s12, 256, %s357_s3, [#allocation4], %s276_s22, %s276_s22, %s277_s23  }
 0x111   :  { %273 = dma.done.wait [#allocation4], 256  }
 0x112   :  { %274 = vsyncadd [#allocation4], 4294967040 }
 0x113   :  { %167 = vsyncpa [#allocation3], 1 }
 0x114   :  { %168 = vsyncpa [#allocation6], 1 }
 0x115   :  { %169 = vsyncpa [#allocation4], 1 }

</bundles_post_ra>
